<compile_context>
chip_gen: v7x
topology: tpu7x:2x2x1
jax: 0.10.0
libtpu: 0.0.40
codegen_flags: <defaults>
</compile_context>

<pallas_src>
import functools

import jax
import jax.numpy as jnp
import numpy as np
from jax.experimental import pallas as pl
from jax.experimental.pallas import tpu as pltpu

BN_EPS = 1e-5      # nn.BatchNorm1d default eps
NORM_EPS = 1e-8    # eps used in the torch forward for the coord normalization


def _round_up(x, m):
    return (x + m - 1) // m * m


# ----------------------------------------------------------------------------
# Pallas kernel: normalize pj, max-pool over neighbors, fused Linear+BN+ReLU
# ----------------------------------------------------------------------------
def _downsample_mlp_kernel(pj_ref, xj_ref, w_ref, b_ref, o_ref, *,
                           nsample, n_xj, eps):
    """One grid step == mt sampled points.

    pj_ref : (S, mt, 3)     relative neighbor coords (neighbor axis leading)
    xj_ref : (S, mt, Cin)   neighbor features
    w_ref  : (Cin+3, Cpad)  BN-folded Linear weight, rows = [xj part; pj part]
    b_ref  : (1, Cpad)      BN-folded bias
    o_ref  : (mt, Cpad)     lane-dense output block
    """
    pj0 = pj_ref[0]                                            # (mt, 3)
    pj_pool = pj0
    xj_pool = xj_ref[0]                                        # (mt, Cin)
    sq_max = jnp.sum(pj0 * pj0, axis=-1, keepdims=True)        # (mt, 1)

    for k in range(1, nsample):                                # static unroll
        pjk = pj_ref[k]                                        # (mt, 3)
        sq_max = jnp.maximum(sq_max,
                             jnp.sum(pjk * pjk, axis=-1, keepdims=True))
        pj_pool = jnp.maximum(pj_pool, pjk)
        xj_pool = jnp.maximum(xj_pool, xj_ref[k])

    # Dividing by the (positive, per-point) max neighbor distance commutes
    # with the neighbor max-pool, so normalize once after pooling.
    pj_pool = pj_pool / (jnp.sqrt(sq_max) + eps)               # (mt, 3)

    z = (jnp.dot(xj_pool, w_ref[:n_xj, :], preferred_element_type=jnp.float32)
         + jnp.dot(pj_pool, w_ref[n_xj:, :], preferred_element_type=jnp.float32)
         + b_ref[...])
    o_ref[...] = jnp.maximum(z, 0.0)


def downsample_mlp_pallas(pj, xj, params, *, block_m=64):
    """Fused normalize + neighbor-max-pool + Linear + BN(eval) + ReLU.

    pj: (M, S, 3) relative neighbor coords, xj: (M, S, Cin) features.
    Returns (M, d_out)."""
    M, S, _ = pj.shape
    Cin = xj.shape[-1]
    d_out = params["W"].shape[0]

    # --- fold BatchNorm1d (eval) into the Linear: one weight + one bias ---
    s = params["gamma"] / jnp.sqrt(params["running_var"] + BN_EPS)   # (d_out,)
    w_eff = (params["W"] * s[:, None]).astype(jnp.float32)           # (d_out, 3+Cin)
    b_eff = (params["b"] - params["running_mean"]) * s + params["beta"]

    # Rows ordered [xj part; pj part] so both in-kernel slices start 8-aligned;
    # pad output channels to a multiple of 128 for lane-dense (unmasked) stores.
    c_pad = max(128, _round_up(d_out, 128))
    w_cat = jnp.concatenate([w_eff[:, 3:].T, w_eff[:, :3].T], axis=0)  # (Cin+3, d_out)
    w_pad = jnp.zeros((Cin + 3, c_pad), jnp.float32).at[:, :d_out].set(w_cat)
    b_pad = jnp.zeros((1, c_pad), jnp.float32).at[:, :d_out].set(b_eff[None, :])

    # --- tile the sampled-point axis (amortize ~0.35us per grid step) ---
    mt = max(8, min(_round_up(block_m, 8), _round_up(M, 8)))
    if _round_up(M, mt) == mt and M > 8:
        # keep >=2 grid steps so v7x megacore can use both TensorCores
        mt = max(8, _round_up((M + 1) // 2, 8))
    m_pad = _round_up(M, mt)

    if m_pad != M:
        pj = jnp.pad(pj, ((0, m_pad - M), (0, 0), (0, 0)))
        xj = jnp.pad(xj, ((0, m_pad - M), (0, 0), (0, 0)))

    # Glue transpose: neighbor axis leading so pj_ref[k]/xj_ref[k] are clean
    # (mt, C) 2-D tiles inside the kernel.
    pjT = jnp.transpose(pj, (1, 0, 2))      # (S, m_pad, 3)
    xjT = jnp.transpose(xj, (1, 0, 2))      # (S, m_pad, Cin)

    kernel = functools.partial(_downsample_mlp_kernel,
                               nsample=S, n_xj=Cin, eps=NORM_EPS)
    out = pl.pallas_call(
        kernel,
        out_shape=jax.ShapeDtypeStruct((m_pad, c_pad), jnp.float32),
        grid=(m_pad // mt,),
        in_specs=[
            pl.BlockSpec((S, mt, 3), lambda i: (0, i, 0)),       # pjT
            pl.BlockSpec((S, mt, Cin), lambda i: (0, i, 0)),     # xjT
            pl.BlockSpec((Cin + 3, c_pad), lambda i: (0, 0)),    # folded weight
            pl.BlockSpec((1, c_pad), lambda i: (0, 0)),          # folded bias
        ],
        out_specs=pl.BlockSpec((mt, c_pad), lambda i: (i, 0)),
        compiler_params=pltpu.CompilerParams(
            dimension_semantics=("parallel",)),
    )(pjT, xjT, w_pad, b_pad)

    return out[:M, :d_out]


# ----------------------------------------------------------------------------
# Plain-JAX glue standing in for the pointops CUDA ops used by the torch code
# ----------------------------------------------------------------------------
def _downsample_offsets(o, stride):
    """n_o[i] computation (uses host values, like .item() in the torch code)."""
    o = np.asarray(jax.device_get(o)).astype(np.int64)
    n_o = [int(o[0]) // stride]
    for i in range(1, o.shape[0]):
        n_o.append(n_o[-1] + (int(o[i]) - int(o[i - 1])) // stride)
    return np.asarray(n_o, np.int32)


def _farthest_point_sample(points, m):
    """Plain-JAX FPS (stand-in for pointops.furthestsampling), segment-local."""
    def body(i, carry):
        dists, idxs = carry
        last = points[idxs[i - 1]]
        d = jnp.sum((points - last[None, :]) ** 2, axis=-1)
        dists = jnp.minimum(dists, d)
        idxs = idxs.at[i].set(jnp.argmax(dists).astype(jnp.int32))
        return dists, idxs

    dists = jnp.full((points.shape[0],), jnp.inf, jnp.float32)
    idxs = jnp.zeros((m,), jnp.int32)
    if m > 1:
        dists, idxs = jax.lax.fori_loop(1, m, body, (dists, idxs))
    return idxs


def _sample_and_group(p, x, o, n_o, nsample):
    """Stand-in for pointops.furthestsampling + queryandgroup(use_xyz=True)."""
    o = np.asarray(o)
    n_o = np.asarray(n_o)
    n_p_parts, pj_parts, xj_parts = [], [], []
    start, n_start = 0, 0
    for b in range(o.shape[0]):
        end, n_end = int(o[b]), int(n_o[b])
        p_seg, x_seg = p[start:end], x[start:end]
        m = n_end - n_start
        sel = _farthest_point_sample(p_seg, m)                 # (m,)
        np_seg = p_seg[sel]                                    # (m, 3)
        d2 = jnp.sum((np_seg[:, None, :] - p_seg[None, :, :]) ** 2, axis=-1)
        _, knn = jax.lax.top_k(-d2, nsample)                   # (m, nsample)
        pj_parts.append(p_seg[knn] - np_seg[:, None, :])       # relative coords
        xj_parts.append(x_seg[knn])
        n_p_parts.append(np_seg)
        start, n_start = end, n_end
    return (jnp.concatenate(n_p_parts, axis=0),
            jnp.concatenate(pj_parts, axis=0),
            jnp.concatenate(xj_parts, axis=0))


def downsampling_forward(p, x, o, params, *, nsample=16, stride=4, block_m=64):
    """JAX equivalent of Downsampling.forward(p, x, o) -> (n_p, x, n_o)."""
    n_o = _downsample_offsets(o, stride)
    n_p, pj, xj = _sample_and_group(p, x, o, n_o, nsample)
    out = downsample_mlp_pallas(pj, xj, params, block_m=block_m)
    return n_p, out, jnp.asarray(n_o, jnp.int32)


# ----------------------------------------------------------------------------
# Pure-JAX reference for the fused MLP part (unfused BN, mirrors torch)
# ----------------------------------------------------------------------------
def _ref_mlp(pj, xj, params):
    norm = jnp.sqrt(jnp.sum(pj ** 2, axis=-1, keepdims=True))          # (M,S,1)
    pjn = pj / (jnp.max(norm, axis=1, keepdims=True) + NORM_EPS)
    pooled = jnp.max(jnp.concatenate([pjn, xj], axis=-1), axis=1)      # (M,3+Cin)
    z = pooled @ params["W"].T + params["b"]
    z = ((z - params["running_mean"]) / jnp.sqrt(params["running_var"] + BN_EPS)
         * params["gamma"] + params["beta"])
    return jnp.maximum(z, 0.0)


if __name__ == "__main__":
    N_total, d_in, d_out, nsample, stride = 64, 32, 32, 16, 4

    key = jax.random.PRNGKey(0)
    ks = jax.random.split(key, 8)
    p = jax.random.normal(ks[0], (N_total, 3), jnp.float32)
    x = jax.random.normal(ks[1], (N_total, d_in), jnp.float32)
    o = np.array([32, 64], np.int32)          # two batch segments of 32 points

    params = {
        "W": jax.random.normal(ks[2], (d_out, d_in + 3), jnp.float32) * 0.1,
        "b": jax.random.normal(ks[3], (d_out,), jnp.float32) * 0.1,
        "gamma": jax.random.uniform(ks[4], (d_out,), jnp.float32, 0.5, 1.5),
        "beta": jax.random.normal(ks[5], (d_out,), jnp.float32) * 0.1,
        "running_mean": jax.random.normal(ks[6], (d_out,), jnp.float32) * 0.1,
        "running_var": jax.random.uniform(ks[7], (d_out,), jnp.float32, 0.5, 1.5),
    }

    # block_m=8 -> M=16 sampled points give a 2-step 'parallel' grid.
    n_p, out, n_o = downsampling_forward(p, x, o, params,
                                         nsample=nsample, stride=stride,
                                         block_m=8)
    out = jax.block_until_ready(out)

    # Reference: identical grouping glue + pure-JAX MLP (unfused BN).
    n_o_np = _downsample_offsets(o, stride)
    _, pj_ref_in, xj_ref_in = _sample_and_group(p, x, o, n_o_np, nsample)
    ref = _ref_mlp(pj_ref_in, xj_ref_in, params)

    M = int(n_o_np[-1])
    assert out.shape == (M, d_out)
    assert n_p.shape == (M, 3)
    assert np.array_equal(np.asarray(n_o), n_o_np)
    np.testing.assert_allclose(np.asarray(out), np.asarray(ref),
                               rtol=1e-5, atol=1e-5)
    print("KERNEL_OK")
</pallas_src>

<mosaic_0001>
module attributes {stable_mosaic.version = 11 : i64} {
  func.func @_downsample_mlp_kernel(%arg0: i32, %arg1: memref<16x8x3xf32, #tpu.memory_space<vmem>>, %arg2: memref<16x8x32xf32, #tpu.memory_space<vmem>>, %arg3: memref<35x128xf32, #tpu.memory_space<vmem>>, %arg4: memref<1x128xf32, #tpu.memory_space<vmem>>, %arg5: memref<8x128xf32, #tpu.memory_space<vmem>>) attributes {dimension_semantics = [#tpu.dimension_semantics<parallel>], iteration_bounds = array<i64: 2>, scalar_prefetch = 0 : i64, scratch_operands = 0 : i64, tpu.core_type = #tpu.core_type<tc>, window_params = [{transform_indices = @transform_0, window_bounds = array<i64: 16, 8, 3>}, {transform_indices = @transform_1, window_bounds = array<i64: 16, 8, 32>}, {pipeline_mode = #tpu.pipeline_mode<synchronous>, transform_indices = @transform_2, window_bounds = array<i64: 35, 128>}, {pipeline_mode = #tpu.pipeline_mode<synchronous>, transform_indices = @transform_3, window_bounds = array<i64: 1, 128>}, {transform_indices = @transform_4, window_bounds = array<i64: 8, 128>}]} {
    %c0 = arith.constant 0 : index
    %c0_0 = arith.constant 0 : index
    %c0_1 = arith.constant 0 : index
    %0 = vector.load %arg1[%c0, %c0_0, %c0_1] : memref<16x8x3xf32, #tpu.memory_space<vmem>>, vector<1x8x3xf32>
    %1 = vector.shape_cast %0 : vector<1x8x3xf32> to vector<8x3xf32>
    %c0_2 = arith.constant 0 : index
    %c0_3 = arith.constant 0 : index
    %c0_4 = arith.constant 0 : index
    %2 = vector.load %arg2[%c0_2, %c0_3, %c0_4] : memref<16x8x32xf32, #tpu.memory_space<vmem>>, vector<1x8x32xf32>
    %3 = vector.shape_cast %2 : vector<1x8x32xf32> to vector<8x32xf32>
    %4 = arith.mulf %1, %1 : vector<8x3xf32>
    %cst = arith.constant dense<0.000000e+00> : vector<8xf32>
    %5 = vector.multi_reduction <add>, %4, %cst [1] : vector<8x3xf32> to vector<8xf32>
    %6 = vector.shape_cast %5 : vector<8xf32> to vector<8x1xf32>
    %c1 = arith.constant 1 : index
    %c0_5 = arith.constant 0 : index
    %c0_6 = arith.constant 0 : index
    %7 = vector.load %arg1[%c1, %c0_5, %c0_6] : memref<16x8x3xf32, #tpu.memory_space<vmem>>, vector<1x8x3xf32>
    %8 = vector.shape_cast %7 : vector<1x8x3xf32> to vector<8x3xf32>
    %9 = arith.mulf %8, %8 : vector<8x3xf32>
    %cst_7 = arith.constant dense<0.000000e+00> : vector<8xf32>
    %10 = vector.multi_reduction <add>, %9, %cst_7 [1] : vector<8x3xf32> to vector<8xf32>
    %11 = vector.shape_cast %10 : vector<8xf32> to vector<8x1xf32>
    %12 = arith.maximumf %6, %11 : vector<8x1xf32>
    %13 = arith.maximumf %1, %8 : vector<8x3xf32>
    %c1_8 = arith.constant 1 : index
    %c0_9 = arith.constant 0 : index
    %c0_10 = arith.constant 0 : index
    %14 = vector.load %arg2[%c1_8, %c0_9, %c0_10] : memref<16x8x32xf32, #tpu.memory_space<vmem>>, vector<1x8x32xf32>
    %15 = vector.shape_cast %14 : vector<1x8x32xf32> to vector<8x32xf32>
    %16 = arith.maximumf %3, %15 : vector<8x32xf32>
    %c2 = arith.constant 2 : index
    %c0_11 = arith.constant 0 : index
    %c0_12 = arith.constant 0 : index
    %17 = vector.load %arg1[%c2, %c0_11, %c0_12] : memref<16x8x3xf32, #tpu.memory_space<vmem>>, vector<1x8x3xf32>
    %18 = vector.shape_cast %17 : vector<1x8x3xf32> to vector<8x3xf32>
    %19 = arith.mulf %18, %18 : vector<8x3xf32>
    %cst_13 = arith.constant dense<0.000000e+00> : vector<8xf32>
    %20 = vector.multi_reduction <add>, %19, %cst_13 [1] : vector<8x3xf32> to vector<8xf32>
    %21 = vector.shape_cast %20 : vector<8xf32> to vector<8x1xf32>
    %22 = arith.maximumf %12, %21 : vector<8x1xf32>
    %23 = arith.maximumf %13, %18 : vector<8x3xf32>
    %c2_14 = arith.constant 2 : index
    %c0_15 = arith.constant 0 : index
    %c0_16 = arith.constant 0 : index
    %24 = vector.load %arg2[%c2_14, %c0_15, %c0_16] : memref<16x8x32xf32, #tpu.memory_space<vmem>>, vector<1x8x32xf32>
    %25 = vector.shape_cast %24 : vector<1x8x32xf32> to vector<8x32xf32>
    %26 = arith.maximumf %16, %25 : vector<8x32xf32>
    %c3 = arith.constant 3 : index
    %c0_17 = arith.constant 0 : index
    %c0_18 = arith.constant 0 : index
    %27 = vector.load %arg1[%c3, %c0_17, %c0_18] : memref<16x8x3xf32, #tpu.memory_space<vmem>>, vector<1x8x3xf32>
    %28 = vector.shape_cast %27 : vector<1x8x3xf32> to vector<8x3xf32>
    %29 = arith.mulf %28, %28 : vector<8x3xf32>
    %cst_19 = arith.constant dense<0.000000e+00> : vector<8xf32>
    %30 = vector.multi_reduction <add>, %29, %cst_19 [1] : vector<8x3xf32> to vector<8xf32>
    %31 = vector.shape_cast %30 : vector<8xf32> to vector<8x1xf32>
    %32 = arith.maximumf %22, %31 : vector<8x1xf32>
    %33 = arith.maximumf %23, %28 : vector<8x3xf32>
    %c3_20 = arith.constant 3 : index
    %c0_21 = arith.constant 0 : index
    %c0_22 = arith.constant 0 : index
    %34 = vector.load %arg2[%c3_20, %c0_21, %c0_22] : memref<16x8x32xf32, #tpu.memory_space<vmem>>, vector<1x8x32xf32>
    %35 = vector.shape_cast %34 : vector<1x8x32xf32> to vector<8x32xf32>
    %36 = arith.maximumf %26, %35 : vector<8x32xf32>
    %c4 = arith.constant 4 : index
    %c0_23 = arith.constant 0 : index
    %c0_24 = arith.constant 0 : index
    %37 = vector.load %arg1[%c4, %c0_23, %c0_24] : memref<16x8x3xf32, #tpu.memory_space<vmem>>, vector<1x8x3xf32>
    %38 = vector.shape_cast %37 : vector<1x8x3xf32> to vector<8x3xf32>
    %39 = arith.mulf %38, %38 : vector<8x3xf32>
    %cst_25 = arith.constant dense<0.000000e+00> : vector<8xf32>
    %40 = vector.multi_reduction <add>, %39, %cst_25 [1] : vector<8x3xf32> to vector<8xf32>
    %41 = vector.shape_cast %40 : vector<8xf32> to vector<8x1xf32>
    %42 = arith.maximumf %32, %41 : vector<8x1xf32>
    %43 = arith.maximumf %33, %38 : vector<8x3xf32>
    %c4_26 = arith.constant 4 : index
    %c0_27 = arith.constant 0 : index
    %c0_28 = arith.constant 0 : index
    %44 = vector.load %arg2[%c4_26, %c0_27, %c0_28] : memref<16x8x32xf32, #tpu.memory_space<vmem>>, vector<1x8x32xf32>
    %45 = vector.shape_cast %44 : vector<1x8x32xf32> to vector<8x32xf32>
    %46 = arith.maximumf %36, %45 : vector<8x32xf32>
    %c5 = arith.constant 5 : index
    %c0_29 = arith.constant 0 : index
    %c0_30 = arith.constant 0 : index
    %47 = vector.load %arg1[%c5, %c0_29, %c0_30] : memref<16x8x3xf32, #tpu.memory_space<vmem>>, vector<1x8x3xf32>
    %48 = vector.shape_cast %47 : vector<1x8x3xf32> to vector<8x3xf32>
    %49 = arith.mulf %48, %48 : vector<8x3xf32>
    %cst_31 = arith.constant dense<0.000000e+00> : vector<8xf32>
    %50 = vector.multi_reduction <add>, %49, %cst_31 [1] : vector<8x3xf32> to vector<8xf32>
    %51 = vector.shape_cast %50 : vector<8xf32> to vector<8x1xf32>
    %52 = arith.maximumf %42, %51 : vector<8x1xf32>
    %53 = arith.maximumf %43, %48 : vector<8x3xf32>
    %c5_32 = arith.constant 5 : index
    %c0_33 = arith.constant 0 : index
    %c0_34 = arith.constant 0 : index
    %54 = vector.load %arg2[%c5_32, %c0_33, %c0_34] : memref<16x8x32xf32, #tpu.memory_space<vmem>>, vector<1x8x32xf32>
    %55 = vector.shape_cast %54 : vector<1x8x32xf32> to vector<8x32xf32>
    %56 = arith.maximumf %46, %55 : vector<8x32xf32>
    %c6 = arith.constant 6 : index
    %c0_35 = arith.constant 0 : index
    %c0_36 = arith.constant 0 : index
    %57 = vector.load %arg1[%c6, %c0_35, %c0_36] : memref<16x8x3xf32, #tpu.memory_space<vmem>>, vector<1x8x3xf32>
    %58 = vector.shape_cast %57 : vector<1x8x3xf32> to vector<8x3xf32>
    %59 = arith.mulf %58, %58 : vector<8x3xf32>
    %cst_37 = arith.constant dense<0.000000e+00> : vector<8xf32>
    %60 = vector.multi_reduction <add>, %59, %cst_37 [1] : vector<8x3xf32> to vector<8xf32>
    %61 = vector.shape_cast %60 : vector<8xf32> to vector<8x1xf32>
    %62 = arith.maximumf %52, %61 : vector<8x1xf32>
    %63 = arith.maximumf %53, %58 : vector<8x3xf32>
    %c6_38 = arith.constant 6 : index
    %c0_39 = arith.constant 0 : index
    %c0_40 = arith.constant 0 : index
    %64 = vector.load %arg2[%c6_38, %c0_39, %c0_40] : memref<16x8x32xf32, #tpu.memory_space<vmem>>, vector<1x8x32xf32>
    %65 = vector.shape_cast %64 : vector<1x8x32xf32> to vector<8x32xf32>
    %66 = arith.maximumf %56, %65 : vector<8x32xf32>
    %c7 = arith.constant 7 : index
    %c0_41 = arith.constant 0 : index
    %c0_42 = arith.constant 0 : index
    %67 = vector.load %arg1[%c7, %c0_41, %c0_42] : memref<16x8x3xf32, #tpu.memory_space<vmem>>, vector<1x8x3xf32>
    %68 = vector.shape_cast %67 : vector<1x8x3xf32> to vector<8x3xf32>
    %69 = arith.mulf %68, %68 : vector<8x3xf32>
    %cst_43 = arith.constant dense<0.000000e+00> : vector<8xf32>
    %70 = vector.multi_reduction <add>, %69, %cst_43 [1] : vector<8x3xf32> to vector<8xf32>
    %71 = vector.shape_cast %70 : vector<8xf32> to vector<8x1xf32>
    %72 = arith.maximumf %62, %71 : vector<8x1xf32>
    %73 = arith.maximumf %63, %68 : vector<8x3xf32>
    %c7_44 = arith.constant 7 : index
    %c0_45 = arith.constant 0 : index
    %c0_46 = arith.constant 0 : index
    %74 = vector.load %arg2[%c7_44, %c0_45, %c0_46] : memref<16x8x32xf32, #tpu.memory_space<vmem>>, vector<1x8x32xf32>
    %75 = vector.shape_cast %74 : vector<1x8x32xf32> to vector<8x32xf32>
    %76 = arith.maximumf %66, %75 : vector<8x32xf32>
    %c8 = arith.constant 8 : index
    %c0_47 = arith.constant 0 : index
    %c0_48 = arith.constant 0 : index
    %77 = vector.load %arg1[%c8, %c0_47, %c0_48] : memref<16x8x3xf32, #tpu.memory_space<vmem>>, vector<1x8x3xf32>
    %78 = vector.shape_cast %77 : vector<1x8x3xf32> to vector<8x3xf32>
    %79 = arith.mulf %78, %78 : vector<8x3xf32>
    %cst_49 = arith.constant dense<0.000000e+00> : vector<8xf32>
    %80 = vector.multi_reduction <add>, %79, %cst_49 [1] : vector<8x3xf32> to vector<8xf32>
    %81 = vector.shape_cast %80 : vector<8xf32> to vector<8x1xf32>
    %82 = arith.maximumf %72, %81 : vector<8x1xf32>
    %83 = arith.maximumf %73, %78 : vector<8x3xf32>
    %c8_50 = arith.constant 8 : index
    %c0_51 = arith.constant 0 : index
    %c0_52 = arith.constant 0 : index
    %84 = vector.load %arg2[%c8_50, %c0_51, %c0_52] : memref<16x8x32xf32, #tpu.memory_space<vmem>>, vector<1x8x32xf32>
    %85 = vector.shape_cast %84 : vector<1x8x32xf32> to vector<8x32xf32>
    %86 = arith.maximumf %76, %85 : vector<8x32xf32>
    %c9 = arith.constant 9 : index
    %c0_53 = arith.constant 0 : index
    %c0_54 = arith.constant 0 : index
    %87 = vector.load %arg1[%c9, %c0_53, %c0_54] : memref<16x8x3xf32, #tpu.memory_space<vmem>>, vector<1x8x3xf32>
    %88 = vector.shape_cast %87 : vector<1x8x3xf32> to vector<8x3xf32>
    %89 = arith.mulf %88, %88 : vector<8x3xf32>
    %cst_55 = arith.constant dense<0.000000e+00> : vector<8xf32>
    %90 = vector.multi_reduction <add>, %89, %cst_55 [1] : vector<8x3xf32> to vector<8xf32>
    %91 = vector.shape_cast %90 : vector<8xf32> to vector<8x1xf32>
    %92 = arith.maximumf %82, %91 : vector<8x1xf32>
    %93 = arith.maximumf %83, %88 : vector<8x3xf32>
    %c9_56 = arith.constant 9 : index
    %c0_57 = arith.constant 0 : index
    %c0_58 = arith.constant 0 : index
    %94 = vector.load %arg2[%c9_56, %c0_57, %c0_58] : memref<16x8x32xf32, #tpu.memory_space<vmem>>, vector<1x8x32xf32>
    %95 = vector.shape_cast %94 : vector<1x8x32xf32> to vector<8x32xf32>
    %96 = arith.maximumf %86, %95 : vector<8x32xf32>
    %c10 = arith.constant 10 : index
    %c0_59 = arith.constant 0 : index
    %c0_60 = arith.constant 0 : index
    %97 = vector.load %arg1[%c10, %c0_59, %c0_60] : memref<16x8x3xf32, #tpu.memory_space<vmem>>, vector<1x8x3xf32>
    %98 = vector.shape_cast %97 : vector<1x8x3xf32> to vector<8x3xf32>
    %99 = arith.mulf %98, %98 : vector<8x3xf32>
    %cst_61 = arith.constant dense<0.000000e+00> : vector<8xf32>
    %100 = vector.multi_reduction <add>, %99, %cst_61 [1] : vector<8x3xf32> to vector<8xf32>
    %101 = vector.shape_cast %100 : vector<8xf32> to vector<8x1xf32>
    %102 = arith.maximumf %92, %101 : vector<8x1xf32>
    %103 = arith.maximumf %93, %98 : vector<8x3xf32>
    %c10_62 = arith.constant 10 : index
    %c0_63 = arith.constant 0 : index
    %c0_64 = arith.constant 0 : index
    %104 = vector.load %arg2[%c10_62, %c0_63, %c0_64] : memref<16x8x32xf32, #tpu.memory_space<vmem>>, vector<1x8x32xf32>
    %105 = vector.shape_cast %104 : vector<1x8x32xf32> to vector<8x32xf32>
    %106 = arith.maximumf %96, %105 : vector<8x32xf32>
    %c11 = arith.constant 11 : index
    %c0_65 = arith.constant 0 : index
    %c0_66 = arith.constant 0 : index
    %107 = vector.load %arg1[%c11, %c0_65, %c0_66] : memref<16x8x3xf32, #tpu.memory_space<vmem>>, vector<1x8x3xf32>
    %108 = vector.shape_cast %107 : vector<1x8x3xf32> to vector<8x3xf32>
    %109 = arith.mulf %108, %108 : vector<8x3xf32>
    %cst_67 = arith.constant dense<0.000000e+00> : vector<8xf32>
    %110 = vector.multi_reduction <add>, %109, %cst_67 [1] : vector<8x3xf32> to vector<8xf32>
    %111 = vector.shape_cast %110 : vector<8xf32> to vector<8x1xf32>
    %112 = arith.maximumf %102, %111 : vector<8x1xf32>
    %113 = arith.maximumf %103, %108 : vector<8x3xf32>
    %c11_68 = arith.constant 11 : index
    %c0_69 = arith.constant 0 : index
    %c0_70 = arith.constant 0 : index
    %114 = vector.load %arg2[%c11_68, %c0_69, %c0_70] : memref<16x8x32xf32, #tpu.memory_space<vmem>>, vector<1x8x32xf32>
    %115 = vector.shape_cast %114 : vector<1x8x32xf32> to vector<8x32xf32>
    %116 = arith.maximumf %106, %115 : vector<8x32xf32>
    %c12 = arith.constant 12 : index
    %c0_71 = arith.constant 0 : index
    %c0_72 = arith.constant 0 : index
    %117 = vector.load %arg1[%c12, %c0_71, %c0_72] : memref<16x8x3xf32, #tpu.memory_space<vmem>>, vector<1x8x3xf32>
    %118 = vector.shape_cast %117 : vector<1x8x3xf32> to vector<8x3xf32>
    %119 = arith.mulf %118, %118 : vector<8x3xf32>
    %cst_73 = arith.constant dense<0.000000e+00> : vector<8xf32>
    %120 = vector.multi_reduction <add>, %119, %cst_73 [1] : vector<8x3xf32> to vector<8xf32>
    %121 = vector.shape_cast %120 : vector<8xf32> to vector<8x1xf32>
    %122 = arith.maximumf %112, %121 : vector<8x1xf32>
    %123 = arith.maximumf %113, %118 : vector<8x3xf32>
    %c12_74 = arith.constant 12 : index
    %c0_75 = arith.constant 0 : index
    %c0_76 = arith.constant 0 : index
    %124 = vector.load %arg2[%c12_74, %c0_75, %c0_76] : memref<16x8x32xf32, #tpu.memory_space<vmem>>, vector<1x8x32xf32>
    %125 = vector.shape_cast %124 : vector<1x8x32xf32> to vector<8x32xf32>
    %126 = arith.maximumf %116, %125 : vector<8x32xf32>
    %c13 = arith.constant 13 : index
    %c0_77 = arith.constant 0 : index
    %c0_78 = arith.constant 0 : index
    %127 = vector.load %arg1[%c13, %c0_77, %c0_78] : memref<16x8x3xf32, #tpu.memory_space<vmem>>, vector<1x8x3xf32>
    %128 = vector.shape_cast %127 : vector<1x8x3xf32> to vector<8x3xf32>
    %129 = arith.mulf %128, %128 : vector<8x3xf32>
    %cst_79 = arith.constant dense<0.000000e+00> : vector<8xf32>
    %130 = vector.multi_reduction <add>, %129, %cst_79 [1] : vector<8x3xf32> to vector<8xf32>
    %131 = vector.shape_cast %130 : vector<8xf32> to vector<8x1xf32>
    %132 = arith.maximumf %122, %131 : vector<8x1xf32>
    %133 = arith.maximumf %123, %128 : vector<8x3xf32>
    %c13_80 = arith.constant 13 : index
    %c0_81 = arith.constant 0 : index
    %c0_82 = arith.constant 0 : index
    %134 = vector.load %arg2[%c13_80, %c0_81, %c0_82] : memref<16x8x32xf32, #tpu.memory_space<vmem>>, vector<1x8x32xf32>
    %135 = vector.shape_cast %134 : vector<1x8x32xf32> to vector<8x32xf32>
    %136 = arith.maximumf %126, %135 : vector<8x32xf32>
    %c14 = arith.constant 14 : index
    %c0_83 = arith.constant 0 : index
    %c0_84 = arith.constant 0 : index
    %137 = vector.load %arg1[%c14, %c0_83, %c0_84] : memref<16x8x3xf32, #tpu.memory_space<vmem>>, vector<1x8x3xf32>
    %138 = vector.shape_cast %137 : vector<1x8x3xf32> to vector<8x3xf32>
    %139 = arith.mulf %138, %138 : vector<8x3xf32>
    %cst_85 = arith.constant dense<0.000000e+00> : vector<8xf32>
    %140 = vector.multi_reduction <add>, %139, %cst_85 [1] : vector<8x3xf32> to vector<8xf32>
    %141 = vector.shape_cast %140 : vector<8xf32> to vector<8x1xf32>
    %142 = arith.maximumf %132, %141 : vector<8x1xf32>
    %143 = arith.maximumf %133, %138 : vector<8x3xf32>
    %c14_86 = arith.constant 14 : index
    %c0_87 = arith.constant 0 : index
    %c0_88 = arith.constant 0 : index
    %144 = vector.load %arg2[%c14_86, %c0_87, %c0_88] : memref<16x8x32xf32, #tpu.memory_space<vmem>>, vector<1x8x32xf32>
    %145 = vector.shape_cast %144 : vector<1x8x32xf32> to vector<8x32xf32>
    %146 = arith.maximumf %136, %145 : vector<8x32xf32>
    %c15 = arith.constant 15 : index
    %c0_89 = arith.constant 0 : index
    %c0_90 = arith.constant 0 : index
    %147 = vector.load %arg1[%c15, %c0_89, %c0_90] : memref<16x8x3xf32, #tpu.memory_space<vmem>>, vector<1x8x3xf32>
    %148 = vector.shape_cast %147 : vector<1x8x3xf32> to vector<8x3xf32>
    %149 = arith.mulf %148, %148 : vector<8x3xf32>
    %cst_91 = arith.constant dense<0.000000e+00> : vector<8xf32>
    %150 = vector.multi_reduction <add>, %149, %cst_91 [1] : vector<8x3xf32> to vector<8xf32>
    %151 = vector.shape_cast %150 : vector<8xf32> to vector<8x1xf32>
    %152 = arith.maximumf %142, %151 : vector<8x1xf32>
    %153 = arith.maximumf %143, %148 : vector<8x3xf32>
    %c15_92 = arith.constant 15 : index
    %c0_93 = arith.constant 0 : index
    %c0_94 = arith.constant 0 : index
    %154 = vector.load %arg2[%c15_92, %c0_93, %c0_94] : memref<16x8x32xf32, #tpu.memory_space<vmem>>, vector<1x8x32xf32>
    %155 = vector.shape_cast %154 : vector<1x8x32xf32> to vector<8x32xf32>
    %156 = arith.maximumf %146, %155 : vector<8x32xf32>
    %157 = math.sqrt %152 : vector<8x1xf32>
    %cst_95 = arith.constant 9.99999993E-9 : f32
    %158 = vector.broadcast %cst_95 : f32 to vector<8x1xf32>
    %159 = arith.addf %157, %158 : vector<8x1xf32>
    %160 = vector.broadcast %159 : vector<8x1xf32> to vector<8x3xf32>
    %161 = arith.divf %153, %160 : vector<8x3xf32>
    %c0_96 = arith.constant 0 : index
    %c0_97 = arith.constant 0 : index
    %162 = vector.load %arg3[%c0_96, %c0_97] : memref<35x128xf32, #tpu.memory_space<vmem>>, vector<32x128xf32>
    %cst_98 = arith.constant dense<0.000000e+00> : vector<8x128xf32>
    %163 = tpu.matmul %156, %162, %cst_98 {dimension_numbers = #tpu.dot_dimension_numbers<[1], [0], [0], [1], [0, 0, 1, 1], [], []>} : vector<8x32xf32>, vector<32x128xf32>, vector<8x128xf32> -> vector<8x128xf32>
    %c32 = arith.constant 32 : index
    %c0_99 = arith.constant 0 : index
    %164 = vector.load %arg3[%c32, %c0_99] : memref<35x128xf32, #tpu.memory_space<vmem>>, vector<3x128xf32>
    %cst_100 = arith.constant dense<0.000000e+00> : vector<8x128xf32>
    %165 = tpu.matmul %161, %164, %cst_100 {dimension_numbers = #tpu.dot_dimension_numbers<[1], [0], [0], [1], [0, 0, 1, 1], [], []>} : vector<8x3xf32>, vector<3x128xf32>, vector<8x128xf32> -> vector<8x128xf32>
    %166 = arith.addf %163, %165 : vector<8x128xf32>
    %c0_101 = arith.constant 0 : index
    %c0_102 = arith.constant 0 : index
    %167 = vector.load %arg4[%c0_101, %c0_102] : memref<1x128xf32, #tpu.memory_space<vmem>>, vector<1x128xf32>
    %168 = vector.broadcast %167 : vector<1x128xf32> to vector<8x128xf32>
    %169 = arith.addf %166, %168 : vector<8x128xf32>
    %cst_103 = arith.constant 0.000000e+00 : f32
    %170 = vector.broadcast %cst_103 : f32 to vector<8x128xf32>
    %171 = arith.maximumf %169, %170 : vector<8x128xf32>
    %c0_104 = arith.constant 0 : index
    %c0_105 = arith.constant 0 : index
    %172 = vector.load %arg5[%c0_104, %c0_105] : memref<8x128xf32, #tpu.memory_space<vmem>>, vector<8x128xf32>
    tpu.vector_store %arg5[%c0_104, %c0_105], %171 {strides = array<i32>} : memref<8x128xf32, #tpu.memory_space<vmem>>, vector<8x128xf32>,
    return
  }
  func.func @transform_0(%arg0: i32) -> (i32, i32, i32) {
    %c0_i32 = arith.constant 0 : i32
    %c0_i32_0 = arith.constant 0 : i32
    %c0_i32_1 = arith.constant 0 : i32
    return %c0_i32, %arg0, %c0_i32_0 : i32, i32, i32
  }
  func.func @transform_1(%arg0: i32) -> (i32, i32, i32) {
    %c0_i32 = arith.constant 0 : i32
    %c0_i32_0 = arith.constant 0 : i32
    %c0_i32_1 = arith.constant 0 : i32
    return %c0_i32, %arg0, %c0_i32_0 : i32, i32, i32
  }
  func.func @transform_2(%arg0: i32) -> (i32, i32) {
    %c0_i32 = arith.constant 0 : i32
    %c0_i32_0 = arith.constant 0 : i32
    %c0_i32_1 = arith.constant 0 : i32
    return %c0_i32, %c0_i32_0 : i32, i32
  }
  func.func @transform_3(%arg0: i32) -> (i32, i32) {
    %c0_i32 = arith.constant 0 : i32
    %c0_i32_0 = arith.constant 0 : i32
    %c0_i32_1 = arith.constant 0 : i32
    return %c0_i32, %c0_i32_0 : i32, i32
  }
  func.func @transform_4(%arg0: i32) -> (i32, i32) {
    %c0_i32 = arith.constant 0 : i32
    %c0_i32_0 = arith.constant 0 : i32
    return %arg0, %c0_i32 : i32, i32
  }
}

</mosaic_0001>

<bundles_post_ra>
// kernel: tpu_custom_call.1
= control target key start
LH: loop header
LB: loop body
LE: loop exit
PB: predicated region body
PF: predicated region fallthrough
CT: control target
= control target key end

     0   :  { %9 = vsyncpa [#allocation5], 0  ;;  %s1311_s0 = inlined_call_operand.vmem [shape: f32[16,16,3], index: 0, kind: input, shape index: {}]   ;;  %s1312_s1 = inlined_call_operand.vmem [shape: f32[16,16,32], index: 1, kind: input, shape index: {}]   ;;  %s1313_s2 = inlined_call_operand.vmem [shape: f32[35,128], index: 2, kind: input, shape index: {}]   ;;  %s1314_s3 = inlined_call_operand.vmem [shape: f32[1,128], index: 3, kind: input, shape index: {}]   ;;  %s1315_s4 = inlined_call_operand.hbm [shape: f32[16,128], index: 4, kind: output, shape index: {}]  }
   0x1   :  { %11 = vsyncpa [#allocation5 + $0x1], 0  ;;  %s1066_s15 = smov 0   ;;  %s1068_s16 = smov 0  }
   0x2   :  { %s1070_s17 = smov 0   ;;  %s1072_s18 = smov 0  }
   0x3 LB: > { %s848_s19 = sadd.s32 4294967295, %s1035_s18   ;;  %s849_s20 = sadd.s32 4294967294, %s1035_s18   ;;  %s1035_s18 = sphi %s1072_s18, %s1322_s18   ;;  %s1031_s17 = sphi %s1070_s17, %s1321_s17   ;;  %s1027_s16 = sphi %s1068_s16, %s1320_s16   ;;  %s1023_s15 = sphi %s1066_s15, %s1319_s15  }
   0x4   : > { %s1089_s21 = sadd.s32 1, %s1035_s18   ;;  %s24_s22 = sadd.s32 1, %s1031_s17 }
   0x5   : > { %s21_s23 = ssub.s32 %s1035_s18, %s1089_s21  ;;  %p31_p0 = scmp.ne.s32.totalorder %s1031_s17, %s1027_s16 }
   0x6   : > { %p22_p1 = scmp.eq.s32.totalorder %s21_s23, 0  ;;  %p32_p2 = scmp.eq.s32.totalorder %s1035_s18, 0 }
   0x7   : > { %p129_p3 = scmp.eq.s32.totalorder %s848_s19, 1  ;;  %p134_p4 = scmp.ne.s32.totalorder %s1027_s16, %s1023_s15 }
   0x8   : > { %s1102_s24 = scalar_select %p22_p1, %s1031_s17, %s24_s22  }
   0x9   : > { %p1104_p5 = por %p32_p2, %p31_p0  ;;  %p1108_p6 = por %p129_p3, %p31_p0 }
   0xa   : > { %p135_p7 = scmp.eq.s32.totalorder %s849_s20, 1  ;;  %p851_p9 = scmp.ge.s32.totalorder %s1035_s18, 2 }
   0xc   : > { %p1112_p8 = por %p135_p7, %p134_p4  ;;  %157 = sbr.rel (%p851_p9) target bundleno = 43 (0x2b), region = 24 }
  0x13   : > { %160 = sbr.rel (!%p1104_p5) target bundleno = 31 (0x1f), region = 28  ;;  %s162_s28 = sand.u32 (%p1104_p5), 1, %s1031_s17  }
  0x14   : > { %s853_s29 = sshll.u32 (%p1104_p5), %s1035_s18, 3  ;;  %s852_s30 = sshll.u32 (%p1104_p5), %s162_s28, 7 }
  0x15   : > { %s1126_s7 = scalar_lea.vmem (%p1104_p5), %s1311_s0, %s853_s29  ;;  %s164_s8 = scalar_lea.vmem (%p1104_p5), [#allocation2], %s852_s30 }
  0x16   : > { %v224_v0 = vld [vmem:[%s1126_s7] sm:$0xff] (%p1104_p5)  ;;  %v226_v1 = vld [vmem:[%s1126_s7 + $0x10] sm:$0xff] (%p1104_p5) }
  0x17   : > { %v228_v2 = vld [vmem:[%s1126_s7 + $0x20] sm:$0xff] (%p1104_p5)  ;;  %225 = vst [vmem:[%s164_s8] sm:$0xff] (%p1104_p5), %v224_v0  ;;  %227 = vst [vmem:[%s164_s8 + $0x8] sm:$0xff] (%p1104_p5), %v226_v1  ;;  %v230_v3 = vld [vmem:[%s1126_s7 + $0x30] sm:$0xff] (%p1104_p5) }
  0x18   : > { %229 = vst [vmem:[%s164_s8 + $0x10] sm:$0xff] (%p1104_p5), %v228_v2  ;;  %v232_v4 = vld [vmem:[%s1126_s7 + $0x40] sm:$0xff] (%p1104_p5)  ;;  %v234_v5 = vld [vmem:[%s1126_s7 + $0x50] sm:$0xff] (%p1104_p5)  ;;  %231 = vst [vmem:[%s164_s8 + $0x18] sm:$0xff] (%p1104_p5), %v230_v3 }
  0x19   : > { %233 = vst [vmem:[%s164_s8 + $0x20] sm:$0xff] (%p1104_p5), %v232_v4  ;;  %235 = vst [vmem:[%s164_s8 + $0x28] sm:$0xff] (%p1104_p5), %v234_v5  ;;  %v236_v6 = vld [vmem:[%s1126_s7 + $0x60] sm:$0xff] (%p1104_p5)  ;;  %v238_v7 = vld [vmem:[%s1126_s7 + $0x70] sm:$0xff] (%p1104_p5) }
  0x1a   : > { %v240_v8 = vld [vmem:[%s1126_s7 + $0x80] sm:$0xff]  ;;  %237 = vst [vmem:[%s164_s8 + $0x30] sm:$0xff] %v236_v6  ;;  %239 = vst [vmem:[%s164_s8 + $0x38] sm:$0xff] %v238_v7  ;;  %v242_v9 = vld [vmem:[%s1126_s7 + $0x90] sm:$0xff] }
  0x1b   : > { %241 = vst [vmem:[%s164_s8 + $0x40] sm:$0xff] %v240_v8  ;;  %v244_v10 = vld [vmem:[%s1126_s7 + $0xa0] sm:$0xff]  ;;  %v246_v11 = vld [vmem:[%s1126_s7 + $0xb0] sm:$0xff]  ;;  %243 = vst [vmem:[%s164_s8 + $0x48] sm:$0xff] %v242_v9 }
  0x1c   : > { %245 = vst [vmem:[%s164_s8 + $0x50] sm:$0xff] %v244_v10  ;;  %247 = vst [vmem:[%s164_s8 + $0x58] sm:$0xff] %v246_v11  ;;  %v248_v12 = vld [vmem:[%s1126_s7 + $0xc0] sm:$0xff]  ;;  %v250_v13 = vld [vmem:[%s1126_s7 + $0xd0] sm:$0xff] }
  0x1d   : > { %v252_v14 = vld [vmem:[%s1126_s7 + $0xe0] sm:$0xff]  ;;  %249 = vst [vmem:[%s164_s8 + $0x60] sm:$0xff] %v248_v12  ;;  %251 = vst [vmem:[%s164_s8 + $0x68] sm:$0xff] %v250_v13  ;;  %v254_v15 = vld [vmem:[%s1126_s7 + $0xf0] sm:$0xff] }
  0x1e   : > { %253 = vst [vmem:[%s164_s8 + $0x70] sm:$0xff] %v252_v14  ;;  %255 = vst [vmem:[%s164_s8 + $0x78] sm:$0xff] %v254_v15 }
  0x1f PF: > { %261 = sbr.rel (!%p1104_p5) target bundleno = 43 (0x2b), region = 66  ;;  %s263_s9 = sand.u32 (%p1104_p5), 1, %s1031_s17  }
  0x20   : > { %s855_s10 = sshll.u32 (%p1104_p5), %s1035_s18, 3  ;;  %s854_s11 = sshll.u32 (%p1104_p5), %s263_s9, 7 }
  0x21   : > { %s1151_s14 = scalar_lea.vmem (%p1104_p5), %s1312_s1, %s855_s10  ;;  %s265_s20 = scalar_lea.vmem (%p1104_p5), [#allocation3], %s854_s11 }
  0x22   : > { %v325_v16 = vld [vmem:[%s1151_s14] sm:$0xff] (%p1104_p5)  ;;  %v327_v17 = vld [vmem:[%s1151_s14 + $0x10] sm:$0xff] (%p1104_p5) }
  0x23   : > { %v329_v18 = vld [vmem:[%s1151_s14 + $0x20] sm:$0xff] (%p1104_p5)  ;;  %326 = vst [vmem:[%s265_s20] sm:$0xff] (%p1104_p5), %v325_v16  ;;  %328 = vst [vmem:[%s265_s20 + $0x8] sm:$0xff] (%p1104_p5), %v327_v17  ;;  %v331_v19 = vld [vmem:[%s1151_s14 + $0x30] sm:$0xff] (%p1104_p5) }
  0x24   : > { %330 = vst [vmem:[%s265_s20 + $0x10] sm:$0xff] (%p1104_p5), %v329_v18  ;;  %v333_v20 = vld [vmem:[%s1151_s14 + $0x40] sm:$0xff] (%p1104_p5)  ;;  %v335_v21 = vld [vmem:[%s1151_s14 + $0x50] sm:$0xff] (%p1104_p5)  ;;  %332 = vst [vmem:[%s265_s20 + $0x18] sm:$0xff] (%p1104_p5), %v331_v19 }
  0x25   : > { %334 = vst [vmem:[%s265_s20 + $0x20] sm:$0xff] (%p1104_p5), %v333_v20  ;;  %336 = vst [vmem:[%s265_s20 + $0x28] sm:$0xff] (%p1104_p5), %v335_v21  ;;  %v337_v22 = vld [vmem:[%s1151_s14 + $0x60] sm:$0xff] (%p1104_p5)  ;;  %v339_v23 = vld [vmem:[%s1151_s14 + $0x70] sm:$0xff] (%p1104_p5) }
  0x26   : > { %v341_v24 = vld [vmem:[%s1151_s14 + $0x80] sm:$0xff]  ;;  %338 = vst [vmem:[%s265_s20 + $0x30] sm:$0xff] %v337_v22  ;;  %340 = vst [vmem:[%s265_s20 + $0x38] sm:$0xff] %v339_v23  ;;  %v343_v25 = vld [vmem:[%s1151_s14 + $0x90] sm:$0xff] }
  0x27   : > { %342 = vst [vmem:[%s265_s20 + $0x40] sm:$0xff] %v341_v24  ;;  %v345_v26 = vld [vmem:[%s1151_s14 + $0xa0] sm:$0xff]  ;;  %v347_v27 = vld [vmem:[%s1151_s14 + $0xb0] sm:$0xff]  ;;  %344 = vst [vmem:[%s265_s20 + $0x48] sm:$0xff] %v343_v25 }
  0x28   : > { %346 = vst [vmem:[%s265_s20 + $0x50] sm:$0xff] %v345_v26  ;;  %348 = vst [vmem:[%s265_s20 + $0x58] sm:$0xff] %v347_v27  ;;  %v349_v28 = vld [vmem:[%s1151_s14 + $0xc0] sm:$0xff]  ;;  %v351_v29 = vld [vmem:[%s1151_s14 + $0xd0] sm:$0xff] }
  0x29   : > { %v353_v30 = vld [vmem:[%s1151_s14 + $0xe0] sm:$0xff]  ;;  %350 = vst [vmem:[%s265_s20 + $0x60] sm:$0xff] %v349_v28  ;;  %352 = vst [vmem:[%s265_s20 + $0x68] sm:$0xff] %v351_v29  ;;  %v355_v31 = vld [vmem:[%s1151_s14 + $0xf0] sm:$0xff] }
  0x2a   : > { %354 = vst [vmem:[%s265_s20 + $0x70] sm:$0xff] %v353_v30  ;;  %356 = vst [vmem:[%s265_s20 + $0x78] sm:$0xff] %v355_v31 }
  0x2b PF: > { %p856_p10 = scmp.ge.s32.totalorder %s1035_s18, 1  ;;  %p361_p11 = scmp.lt.s32.totalorder %s1035_s18, 3 }
  0x2d   : > { %p362_p12 = pnand %p856_p10, %p361_p11 }
  0x2e   : > { %s1172_s22 = sand.u32 (!%p362_p12), 1, %s1027_s16   ;;  %vm407_vm0 = vcmask (!%p362_p12), 23552   ;;  %vm594_vm1 = vcmask (!%p362_p12), 1042432   ;;  %vm1039_vm2 = vmmov (!%p362_p12), 0   ;;  %vm668_vm3 = vcmask (!%p362_p12), 261120  }
  0x2f   : > { %365 = sbr.rel (%p362_p12) target bundleno = 491 (0x1eb), region = 104  ;;  %s857_s23 = sshll.u32 (!%p362_p12), %s1172_s22, 7 }
  0x30   : > { %s1177_s25 = scalar_lea.vmem (!%p362_p12), [#allocation2], %s857_s23  ;;  %s1221_s28 = scalar_lea.vmem (!%p362_p12), [#allocation3], %s857_s23 }
  0x31   : > { %v404_v32 = vld [vmem:[%s1177_s25] sm:$0xff] (!%p362_p12)  ;;  %v862_v33 = vld [vmem:[%s1177_s25 + $0x10] sm:$0xff] (!%p362_p12)  ;;  %v860_v34 = vld [vmem:[%s1177_s25 + $0x8] sm:$0xff] (!%p362_p12)  ;;  %s859_s13 = sshll.u32 (!%p362_p12), %s1172_s22, 3  ;;  %s895_s23 = sshll.u32 (!%p362_p12), %s848_s19, 7 }
  0x32   : > { %v406_v35 = vmul.f32 (!%p362_p12), %v404_v32, %v404_v32  ;;  %v424_v36 = vmul.f32 (!%p362_p12), %v862_v33, %v862_v33  ;;  %v413_v37 = vmul.f32 (!%p362_p12), %v860_v34, %v860_v34  ;;  %v418_v38 = vmax.f32 (!%p362_p12), %v404_v32, %v860_v34  ;;  %v864_v39 = vld [vmem:[%s1177_s25 + $0x18] sm:$0xff] (!%p362_p12)  ;;  %v866_v40 = vld [vmem:[%s1177_s25 + $0x20] sm:$0xff] (!%p362_p12)  ;;  %v868_v42 = vld [vmem:[%s1177_s25 + $0x28] sm:$0xff] (!%p362_p12)  ;;  %s1267_s5 = scalar_lea.hbm (!%p362_p12), %s1315_s4, %s895_s23  ;;  %s753_s6 = scalar_lea.sflag (!%p362_p12), [#allocation5], %s1172_s22 }
  0x33   : > { %v435_v41 = vmul.f32 (!%p362_p12), %v864_v39, %v864_v39  ;;  %v446_v46 = vmul.f32 (!%p362_p12), %v866_v40, %v866_v40  ;;  %v457_v50 = vmul.f32 (!%p362_p12), %v868_v42, %v868_v42  ;;  %v870_v51 = vld [vmem:[%s1177_s25 + $0x30] sm:$0xff] (!%p362_p12)  ;;  %v872_v52 = vld [vmem:[%s1177_s25 + $0x38] sm:$0xff] (!%p362_p12)  ;;  %v874_v59 = vld [vmem:[%s1177_s25 + $0x40] sm:$0xff] (!%p362_p12)  ;;  %s1040_s19 = smov (!%p362_p12), [#allocation4]  }
  0x34   : > { %v408_v43 = vsel (!%p362_p12), %vm407_vm0, %v406_v35, 0.0  ;;  %v425_v44 = vsel (!%p362_p12), %vm407_vm0, %v424_v36, 0.0  ;;  %v429_v45 = vmax.f32 (!%p362_p12), %v418_v38, %v862_v33  ;;  %v414_v47 = vsel (!%p362_p12), %vm407_vm0, %v413_v37, 0.0  ;;  %v876_v60 = vld [vmem:[%s1177_s25 + $0x48] sm:$0xff] (!%p362_p12)  ;;  %v878_v3 = vld [vmem:[%s1177_s25 + $0x50] sm:$0xff] (!%p362_p12)  ;;  %v880_v4 = vld [vmem:[%s1177_s25 + $0x58] sm:$0xff] (!%p362_p12) }
  0x35   : > { %409 = vadd.xlane.f32.xlu0 (!%p362_p12), %v408_v43  ;;  %426 = vadd.xlane.f32.xlu1 (!%p362_p12), %v425_v44  ;;  %v436_v48 = vsel (!%p362_p12), %vm407_vm0, %v435_v41, 0.0  ;;  %v447_v54 = vsel (!%p362_p12), %vm407_vm0, %v446_v46, 0.0  ;;  %v458_v55 = vsel (!%p362_p12), %vm407_vm0, %v457_v50, 0.0  ;;  %v468_v57 = vmul.f32 (!%p362_p12), %v870_v51, %v870_v51  ;;  %v882_v11 = vld [vmem:[%s1177_s25 + $0x60] sm:$0xff] (!%p362_p12)  ;;  %v884_v12 = vld [vmem:[%s1177_s25 + $0x68] sm:$0xff] (!%p362_p12)  ;;  %v886_v19 = vld [vmem:[%s1177_s25 + $0x70] sm:$0xff] (!%p362_p12) }
  0x36   : > { %v440_v49 = vmax.f32 %v429_v45, %v864_v39  ;;  %v479_v58 = vmul.f32 %v872_v52, %v872_v52  ;;  %v490_v62 = vmul.f32 %v874_v59, %v874_v59  ;;  %v501_v2 = vmul.f32 %v876_v60, %v876_v60  ;;  %v1207_v20 = vld [vmem:[%s1177_s25 + $0x78] sm:$0xff]  ;;  %v405_v31 = vld [vmem:[%s1221_s28] sm:$0xff]  ;;  %v861_v32 = vld [vmem:[%s1221_s28 + $0x8] sm:$0xff]  ;;  %s403_s25 = scalar_lea.vmem [#allocation4], %s859_s13  ;;  %s977_s8 = sshll.u32 %s1040_s19, 4  ;;  %s978_s8 = int_to_ptr.vmem [resolvable:$false] %s977_s8 }
  0x37   : > { %v469_v63 = vsel %vm407_vm0, %v468_v57, 0.0  ;;  %v512_v6 = vmul.f32 %v878_v3, %v878_v3  ;;  %v523_v10 = vmul.f32 %v880_v4, %v880_v4  ;;  %v534_v14 = vmul.f32 %v882_v11, %v882_v11  ;;  %v863_v34 = vld [vmem:[%s1221_s28 + $0x10] sm:$0xff]  ;;  %v865_v36 = vld [vmem:[%s1221_s28 + $0x18] sm:$0xff]  ;;  %v867_v38 = vld [vmem:[%s1221_s28 + $0x20] sm:$0xff]  ;;  %s979_s9 = scalar_lea.vmem %s978_s8, 256 }
  0x38   : > { %v451_v53 = vmax.f32 %v440_v49, %v866_v40  ;;  %v480_v0 = vsel %vm407_vm0, %v479_v58, 0.0  ;;  %v491_v7 = vsel %vm407_vm0, %v490_v62, 0.0  ;;  %v502_v8 = vsel %vm407_vm0, %v501_v2, 0.0  ;;  %v869_v40 = vld [vmem:[%s1221_s28 + $0x28] sm:$0xff]  ;;  %v873_v44 = vld [vmem:[%s1221_s28 + $0x38] sm:$0xff]  ;;  %v875_v46 = vld [vmem:[%s1221_s28 + $0x40] sm:$0xff] }
  0x39   : > { %415 = vadd.xlane.f32.xlu0 %v414_v47  ;;  %437 = vadd.xlane.f32.xlu1 %v436_v48  ;;  %v513_v15 = vsel %vm407_vm0, %v512_v6, 0.0  ;;  %v524_v16 = vsel %vm407_vm0, %v523_v10, 0.0  ;;  %v545_v18 = vmul.f32 %v884_v12, %v884_v12  ;;  %v535_v22 = vsel %vm407_vm0, %v534_v14, 0.0  ;;  %v586_v47 = vld [vmem:[%s1313_s2] sm:$0xff]  ;;  %v587_v48 = vld [vmem:[%s1313_s2 + $0x8] sm:$0xff]  ;;  %v588_v49 = vld [vmem:[%s1313_s2 + $0x10] sm:$0xff] }
  0x3a   : > { %v462_v56 = vmax.f32 %v451_v53, %v868_v42  ;;  %v556_v25 = vmul.f32 %v886_v19, %v886_v19  ;;  %v567_v26 = vmul.f32 %v1207_v20, %v1207_v20  ;;  %v421_v33 = vmax.f32 %v405_v31, %v861_v32  ;;  %v871_v42 = vld [vmem:[%s1221_s28 + $0x30] sm:$0xff]  ;;  %v589_v53 = vld [vmem:[%s1313_s2 + $0x18] sm:$0xff]  ;;  %v883_v62 = vld [vmem:[%s1221_s28 + $0x60] sm:$0xff] }
  0x3b   : > { %v546_v23 = vsel %vm407_vm0, %v545_v18, 0.0  ;;  %v879_v58 = vld [vmem:[%s1221_s28 + $0x50] sm:$0xff] }
  0x3c   : > { %v473_v61 = vmax.f32 %v462_v56, %v870_v51  ;;  %v557_v28 = vsel %vm407_vm0, %v556_v25, 0.0  ;;  %v568_v29 = vsel %vm407_vm0, %v567_v26, 0.0  ;;  %v432_v35 = vmax.f32 %v421_v33, %v863_v34  ;;  %v877_v56 = vld [vmem:[%s1221_s28 + $0x48] sm:$0xff]  ;;  %v887_v2 = vld [vmem:[%s1221_s28 + $0x70] sm:$0xff] }
  0x3d   : > { %448 = vadd.xlane.f32.xlu0 %v447_v54  ;;  %459 = vadd.xlane.f32.xlu1 %v458_v55  ;;  %v1037_v51 = vmov 0.0|0.0   ;;  %v1038_v54 = vmov 0.0   ;;  %v590_v55 = vld [vmem:[%s1313_s2 + $0x20] sm:$0x7] }
  0x3e   : > { %v484_v1 = vmax.f32 %v473_v61, %v872_v52  ;;  %v443_v37 = vmax.f32 %v432_v35, %v865_v36  ;;  %921 = vmatprep.subr.bf16.mxu1 %v1037_v51  ;;  %v922_v52 = vpack.c.bf16 %v587_v48, %v586_v47  ;;  %905 = vmatprep.subr.mxu0 %v1038_v54 }
  0x3f   : > { %918 = vmatprep.mubr.msk.f32.mxu1 %vm1039_vm2, %v1038_v54  ;;  %906 = vmatpush3.msk.msra.mxu0 %vm594_vm1, %v590_v55 }
  0x40   : > { %v495_v5 = vmax.f32 %v484_v1, %v874_v59  ;;  %v454_v39 = vmax.f32 %v443_v37, %v867_v38  ;;  %923 = vmatpush3.bf16.msra.mxu1 %v922_v52  ;;  %v925_v59 = vpack.c.bf16 %v589_v53, %v588_v49  ;;  %907 = vmatprep.mubr.msk.f32.mxu0 %vm1039_vm2, %v1038_v54  ;;  %v893_v52 = vld [vmem:[%s1314_s3] ss:$0 sm:$0xff] }
  0x41   : > { %470 = vadd.xlane.f32.xlu0 %v469_v63  ;;  %481 = vadd.xlane.f32.xlu1 %v480_v0  ;;  %v885_v0 = vld [vmem:[%s1221_s28 + $0x68] sm:$0xff] }
  0x42   : > { %v506_v9 = vmax.f32 %v495_v5, %v876_v60  ;;  %v465_v41 = vmax.f32 %v454_v39, %v869_v40  ;;  %v881_v60 = vld [vmem:[%s1221_s28 + $0x58] sm:$0xff]  ;;  %924 = vmatprep.subr.bf16.mxu1 %v1037_v51 }
  0x44   : > { %v517_v13 = vmax.f32 %v506_v9, %v878_v3  ;;  %v476_v43 = vmax.f32 %v465_v41, %v871_v42  ;;  %926 = vmatpush3.bf16.msra.mxu1 %v925_v59 }
  0x45   : > { %492 = vadd.xlane.f32.xlu0 %v491_v7  ;;  %503 = vadd.xlane.f32.xlu1 %v502_v8 }
  0x46   : > { %v528_v17 = vmax.f32 %v517_v13, %v880_v4  ;;  %v487_v45 = vmax.f32 %v476_v43, %v873_v44  ;;  %v889_v4 = vld [vmem:[%s1221_s28 + $0x78] sm:$0xff]  ;;  %s766_s28 = sshll.u32 %s403_s25, 4  ;;  %s1269_s28 = int_to_ptr.vmem [resolvable:$true] %s766_s28 }
  0x47   : > { %s973_s7 = scalar_lea.vmem %s1269_s28, 128  ;;  %p980_p2 = scmp.lt.s32.totalorder %s1269_s28, %s978_s8 }
  0x48   : > { %v539_v21 = vmax.f32 %v528_v17, %v882_v11  ;;  %v498_v50 = vmax.f32 %v487_v45, %v875_v46  ;;  %p974_p13 = scmp.ne.s32.totalorder %s1269_s28, %s973_s7  ;;  %p981_p3 = scmp.lt.s32.totalorder %s979_s9, %s973_s7 }
  0x49   : > { %514 = vadd.xlane.f32.xlu0 %v513_v15  ;;  %525 = vadd.xlane.f32.xlu1 %v524_v16 }
  0x4a   : > { %v550_v24 = vmax.f32 %v539_v21, %v884_v12  ;;  %v509_v57 = vmax.f32 %v498_v50, %v877_v56  ;;  %p975_p0 = pnand %p974_p13, %p1108_p6  ;;  %p982_p4 = por %p981_p3, %p980_p2 }
  0x4c   : > { %v1213_v27 = vmax.f32 %v550_v24, %v886_v19  ;;  %v520_v61 = vmax.f32 %v509_v57, %v879_v58  ;;  %p976_p1 = pneg %p975_p0 }
  0x4d   : > { %536 = vadd.xlane.f32.xlu0 %v535_v22  ;;  %547 = vadd.xlane.f32.xlu1 %v546_v23 }
  0x4e   : > { %v572_v30 = vmax.f32 %v1213_v27, %v1207_v20  ;;  %v531_v63 = vmax.f32 %v520_v61, %v881_v60  ;;  %p983_p5 = pnand %p982_p4, %p976_p1 }
  0x50   : > { %v542_v1 = vmax.f32 %v531_v63, %v883_v62 }
  0x51   : > { %558 = vadd.xlane.f32.xlu0 %v557_v28  ;;  %569 = vadd.xlane.f32.xlu1 %v568_v29 }
  0x52   : > { %v553_v3 = vmax.f32 %v542_v1, %v885_v0 }
  0x54   : > { %v564_v5 = vmax.f32 %v553_v3, %v887_v2 }
  0x56   : > { %v575_v6 = vmax.f32 %v564_v5, %v889_v4 }
  0x58   : > { %919 = vmatmul.mubr.msk.f32.vlgmr.msra.gmra.mrb[0].mxu1 %vm668_vm3, %v575_v6 }
  0xc2   : > { %v410_v7 = vpop.xlane.xlu0 %409  ;;  %v427_v8 = vpop.xlane.xlu1 %426 }
  0xc6   : > { %v416_v9 = vpop.xlane.xlu0 %415  ;;  %v438_v10 = vpop.xlane.xlu1 %437 }
  0xc7   : > { %v417_v11 = vmax.f32 %v410_v7, %v416_v9 }
  0xc9   : > { %v428_v12 = vmax.f32 %v417_v11, %v427_v8 }
  0xca   : > { %v449_v13 = vpop.xlane.xlu0 %448  ;;  %v460_v14 = vpop.xlane.xlu1 %459 }
  0xcb   : > { %v439_v15 = vmax.f32 %v428_v12, %v438_v10 }
  0xcd   : > { %v450_v16 = vmax.f32 %v439_v15, %v449_v13 }
  0xce   : > { %v471_v17 = vpop.xlane.xlu0 %470  ;;  %v482_v18 = vpop.xlane.xlu1 %481 }
  0xcf   : > { %v461_v19 = vmax.f32 %v450_v16, %v460_v14 }
  0xd1   : > { %v472_v21 = vmax.f32 %v461_v19, %v471_v17 }
  0xd2   : > { %v493_v22 = vpop.xlane.xlu0 %492  ;;  %v504_v23 = vpop.xlane.xlu1 %503 }
  0xd3   : > { %v483_v24 = vmax.f32 %v472_v21, %v482_v18 }
  0xd5   : > { %v494_v25 = vmax.f32 %v483_v24, %v493_v22 }
  0xd6   : > { %v515_v26 = vpop.xlane.xlu0 %514  ;;  %v526_v28 = vpop.xlane.xlu1 %525 }
  0xd7   : > { %v505_v29 = vmax.f32 %v494_v25, %v504_v23 }
  0xd9   : > { %v516_v31 = vmax.f32 %v505_v29, %v515_v26 }
  0xda   : > { %v537_v32 = vpop.xlane.xlu0 %536  ;;  %v548_v33 = vpop.xlane.xlu1 %547 }
  0xdb   : > { %v527_v34 = vmax.f32 %v516_v31, %v526_v28 }
  0xdd   : > { %v538_v35 = vmax.f32 %v527_v34, %v537_v32 }
  0xde   : > { %v559_v36 = vpop.xlane.xlu0 %558  ;;  %v570_v38 = vpop.xlane.xlu1 %569 }
  0xdf   : > { %v549_v37 = vmax.f32 %v538_v35, %v548_v33 }
  0xe1   : > { %v560_v39 = vmax.f32 %v549_v37, %v559_v36 }
  0xe3   : > { %v571_v40 = vmax.f32 %v560_v39, %v570_v38 }
  0xe5   : > { %969 = vrsqrt.f32 %v571_v40  ;;  %vm578_vm4 = vcmp.eq.f32.partialorder %v571_v40, inf  ;;  %v581_v43 = vand.u32 2147483648, %v571_v40  ;;  %vm580_vm5 = vcmp.eq.f32.partialorder %v571_v40, 0.0 }
  0xef   : > { %v970_v41 = vpop.eup %969 }
  0xf0   : > { %v577_v42 = vmul.f32 %v970_v41, %v571_v40 }
  0xf2   : > { %v579_v44 = vsel %vm578_vm4, %v571_v40, %v577_v42 }
  0xf3   : > { %v582_v45 = vsel %vm580_vm5, %v581_v43, %v579_v44 }
  0xf4   : > { %v583_v46 = vadd.f32 1e-08, %v582_v45 }
  0xf6   : > { %971 = vrcp.f32 %v583_v46 }
 0x100   : > { %v972_v47 = vpop.eup %971 }
 0x101   : > { %v585_v48 = vmul.f32 %v972_v47, %v572_v30 }
 0x103   : > { %908 = vmatmul.mubr.msk.f32.vlgmr.msra.gmra.mrb[0].mxu0 %vm407_vm0, %v585_v48 }
 0x12b   : > { %v738_v49 = vpop.f32.mrb[0].mxu1 }
 0x12c   : > { %v920_v50 = vpop.f32.mrb[1].mxu1 }
 0x1d6   : > { %v664_v51 = vpop.f32.mrb[0].mxu0 }
 0x1d7   : > { %v739_v53 = vadd.f32 %v738_v49, %v664_v51  ;;  %v909_v54 = vpop.f32.mrb[1].mxu0 }
 0x1d9   : > { %v749_v20 = vadd.f32 %v893_v52, %v739_v53 }
 0x1db   : > { %v750_v27 = vmax.f32 %v749_v20, 0.0 }
 0x1dd   : > { %751 = vst [vmem:[%s403_s25] sm:$0xff] %v750_v27 }
 0x1de   : > { %986 = shalt.err (!%p983_p5)
}
 0x1df   : > { %s987_s22 = scalar_lea.hbm %s1267_s5, 128  ;;  %s991_s12 = scalar_lea.hbm %s1315_s4, 256 }
 0x1e0   : > { %p988_p7 = scmp.ne.s32.totalorder %s1267_s5, %s987_s22  ;;  %p992_p12 = scmp.lt.u32.totalorder %s1267_s5, %s1315_s4 }
 0x1e1   : > { %p993_p13 = scmp.lt.u32.totalorder %s991_s12, %s987_s22  ;;  %p995_p1 = scmp.lt.u32.totalorder %s987_s22, %s1267_s5 }
 0x1e2   : > { %p989_p10 = pnand %p988_p7, %p1108_p6 }
 0x1e3   : > { %p994_p0 = por %p993_p13, %p992_p12 }
 0x1e4   : > { %p990_p11 = pneg %p989_p10 }
 0x1e5   : > { %p996_p2 = por %p995_p1, %p994_p0 }
 0x1e7   : > { %p997_p3 = pnand %p996_p2, %p990_p11 }
 0x1e9   : > { %1000 = shalt.err (!%p997_p3)
}
 0x1ea   : > { %927 = dma.vmem_to_hbm [thread:$0]  (%p1108_p6), %s1269_s28, 128, %s1267_s5, %s753_s6  }
 0x1eb PF: > { %s778_s20 = sand.u32 1, %s1023_s15   ;;  %p930_p4 = pnand %p851_p9, %p1112_p8 }
 0x1ec   : > { %s779_s23 = scalar_lea.sflag [#allocation5], %s778_s20 }
 0x1ed   : > { %1018 = dma.done.wait (!%p930_p4), %s779_s23, 128  }
 0x1ee   : > { %1020 = vsyncadd (!%p930_p4), %s779_s23, 4294967168  ;;  %p14_p5 = scmp.ge.s32.totalorder %s1089_s21, 4   ;;  %s1319_s15 = smov %s1027_s16 }
 0x1ef   : > { %s1320_s16 = smov %s1031_s17  ;;  %s1321_s17 = smov %s1102_s24 }
 0x1f0   : > { %s1322_s18 = smov %s1089_s21  ;;  %16 = sbr.rel (!%p14_p5) target bundleno = 3 (0x3), region = 190 }
 0x1f7   :  { %784 = vsyncpa [#allocation5], 1 }
 0x1f8   :  { %786 = vsyncpa [#allocation5 + $0x1], 1 }

</bundles_post_ra>
